<compile_context>
chip_gen: v6e
topology: v6e:2x2x1
jax: 0.10.0
libtpu: 0.0.40
codegen_flags: <defaults>
</compile_context>

<pallas_src>
import jax
import jax.numpy as jnp
from jax.experimental import pallas as pl
from jax.experimental.pallas import tpu as pltpu


def _round_up(x, m):
    return (x + m - 1) // m * m


def _resblock_kernel_shortcut(x_ref, w0_ref, b0_ref, w1_ref, b1_ref, ws_ref, o_ref):
    """Fused: relu -> fc0 -> relu -> fc1, plus linear shortcut, plus residual add."""
    x = x_ref[...]
    h0 = jnp.maximum(x, 0)                                      # actvn(x), MXU-input dtype
    net = jnp.dot(h0, w0_ref[...], preferred_element_type=jnp.float32) \
        + b0_ref[...].astype(jnp.float32)                       # f32 accumulate + bias
    h1 = jnp.maximum(net, 0.0).astype(w1_ref.dtype)             # actvn(net), cast for MXU
    dx = jnp.dot(h1, w1_ref[...], preferred_element_type=jnp.float32) \
        + b1_ref[...].astype(jnp.float32)
    x_s = jnp.dot(x, ws_ref[...], preferred_element_type=jnp.float32)   # shortcut(x)
    o_ref[...] = (x_s + dx).astype(o_ref.dtype)                 # residual add in f32


def _resblock_kernel_identity(x_ref, w0_ref, b0_ref, w1_ref, b1_ref, o_ref):
    """Same as above but size_in == size_out -> identity shortcut."""
    x = x_ref[...]
    h0 = jnp.maximum(x, 0)
    net = jnp.dot(h0, w0_ref[...], preferred_element_type=jnp.float32) \
        + b0_ref[...].astype(jnp.float32)
    h1 = jnp.maximum(net, 0.0).astype(w1_ref.dtype)
    dx = jnp.dot(h1, w1_ref[...], preferred_element_type=jnp.float32) \
        + b1_ref[...].astype(jnp.float32)
    o_ref[...] = (x.astype(jnp.float32) + dx).astype(o_ref.dtype)


def resnet_block_fc(x, params, *, block_n=512, pad_lanes=True, compute_dtype=None):
    """x: (N, size_in).  params: dict with w0, b0, w1, b1 and optionally ws.

    compute_dtype: optional dtype (e.g. jnp.bfloat16) for x / weights on the MXU;
    biases, accumulation and the residual add remain in float32.
    """
    N, size_in = x.shape
    w0, b0 = params["w0"], params["b0"]
    w1, b1 = params["w1"], params["b1"]
    ws = params.get("ws")
    size_h = w0.shape[1]
    size_out = w1.shape[1]
    identity = ws is None
    if identity:
        assert size_in == size_out

    if compute_dtype is not None:
        x = x.astype(compute_dtype)
        w0 = w0.astype(compute_dtype)
        w1 = w1.astype(compute_dtype)
        if ws is not None:
            ws = ws.astype(compute_dtype)
    out_dtype = x.dtype
    b0 = b0.reshape(1, -1).astype(jnp.float32)
    b1 = b1.reshape(1, -1).astype(jnp.float32)

    # --- lane-dense feature dims (multiples of 128): unmasked vld/vst, fuller MXU ---
    if pad_lanes:
        p_in, p_h, p_out = (_round_up(d, 128) for d in (size_in, size_h, size_out))
    else:
        p_in, p_h, p_out = size_in, size_h, size_out

    def pad2(a, r, c):
        return jnp.pad(a, ((0, r - a.shape[0]), (0, c - a.shape[1])))

    if p_in != size_in:
        x = jnp.pad(x, ((0, 0), (0, p_in - size_in)))
    w0 = pad2(w0, p_in, p_h)
    b0 = pad2(b0, 1, p_h)
    w1 = pad2(w1, p_h, p_out)
    b1 = pad2(b1, 1, p_out)
    if not identity:
        ws = pad2(ws, p_in, p_out)

    # --- batch tiling: largest multiple-of-8 tile <= block_n, pad N to a full grid ---
    blk = max(8, min(_round_up(block_n, 8), _round_up(N, 8)))
    n_pad = _round_up(N, blk)
    if n_pad != N:
        x = jnp.pad(x, ((0, n_pad - N), (0, 0)))
    grid = (n_pad // blk,)

    # Whole (padded) weight matrices live in VMEM; only the batch axis is tiled.
    # index_map returns the same block every step -> weights are DMA'd once, not per tile.
    # TODO(synk): for very large feature dims (e.g. 4096x4096 f32 on v7x's 64 MiB VMEM)
    # add a K-reduction grid axis with an f32 accumulator instead of full-weight blocks.
    w_spec = lambda shape: pl.BlockSpec(shape, lambda i: (0, 0))
    in_specs = [
        pl.BlockSpec((blk, p_in), lambda i: (i, 0)),   # x tile
        w_spec((p_in, p_h)),                           # w0
        w_spec((1, p_h)),                              # b0 (f32)
        w_spec((p_h, p_out)),                          # w1
        w_spec((1, p_out)),                            # b1 (f32)
    ]
    args = [x, w0, b0, w1, b1]
    if identity:
        kernel = _resblock_kernel_identity
    else:
        kernel = _resblock_kernel_shortcut
        in_specs.append(w_spec((p_in, p_out)))         # ws
        args.append(ws)

    # --- cost estimate (advisory) ---
    itemsize = jnp.dtype(x.dtype).itemsize
    out_itemsize = jnp.dtype(out_dtype).itemsize
    flops = 2 * n_pad * (p_in * p_h + p_h * p_out
                         + (0 if identity else p_in * p_out))
    bytes_accessed = (
        n_pad * p_in * itemsize
        + n_pad * p_out * out_itemsize
        + (w0.size + w1.size + (0 if identity else ws.size)) * itemsize
        + (b0.size + b1.size) * 4
    )
    cost = pl.CostEstimate(flops=flops, transcendentals=0,
                           bytes_accessed=bytes_accessed)

    # --- VMEM budget: double-buffered x/out tiles + resident weights + f32 headroom ---
    tile_bytes = 2 * blk * p_in * itemsize + 2 * blk * p_out * out_itemsize
    weight_bytes = 2 * ((w0.size + w1.size + (0 if identity else ws.size)) * itemsize
                        + (b0.size + b1.size) * 4)
    scratch_headroom = blk * (p_in + p_h + 2 * p_out) * 4      # in-kernel f32 temps
    vmem_limit = int(min(max(tile_bytes + weight_bytes + scratch_headroom + (4 << 20),
                             32 << 20),
                         64 << 20))                            # stay portable to v7x

    out = pl.pallas_call(
        kernel,
        out_shape=jax.ShapeDtypeStruct((n_pad, p_out), out_dtype),
        grid_spec=pltpu.PrefetchScalarGridSpec(
            num_scalar_prefetch=0,
            grid=grid,
            in_specs=in_specs,
            out_specs=pl.BlockSpec((blk, p_out), lambda i: (i, 0)),
        ),
        compiler_params=pltpu.CompilerParams(
            dimension_semantics=("parallel",),
            vmem_limit_bytes=vmem_limit,
        ),
        cost_estimate=cost,
    )(*args)

    return out[:N, :size_out]


def init_params(key, size_in, size_out=None, size_h=None, dtype=jnp.float32):
    """Deterministic synthetic init matching ResnetBlockFC parameter shapes."""
    if size_out is None:
        size_out = size_in
    if size_h is None:
        size_h = min(size_in, size_out)
    k0, kb0, kb1, ks = jax.random.split(key, 4)
    scale0 = 1.0 / jnp.sqrt(size_in)
    scaleh = 1.0 / jnp.sqrt(size_h)
    params = {
        # stored as (in, out) == transpose of nn.Linear.weight
        "w0": jax.random.uniform(k0, (size_in, size_h), dtype, -scale0, scale0),
        "b0": jax.random.uniform(kb0, (size_h,), dtype, -scale0, scale0),
        "w1": jnp.zeros((size_h, size_out), dtype),            # nn.init.zeros_(fc_1.weight)
        "b1": jax.random.uniform(kb1, (size_out,), dtype, -scaleh, scaleh),
    }
    if size_in != size_out:
        params["ws"] = jax.random.uniform(
            ks, (size_in, size_out), dtype, -scale0, scale0)    # bias-free shortcut
    return params


def reference(x, params):
    h = jnp.maximum(x, 0.0)
    net = h @ params["w0"] + params["b0"]
    dx = jnp.maximum(net, 0.0) @ params["w1"] + params["b1"]
    x_s = x @ params["ws"] if "ws" in params else x
    return x_s + dx


if __name__ == "__main__":
    key = jax.random.PRNGKey(0)
    kx, kp = jax.random.split(key)

    # size_in != size_out -> exercises the linear shortcut path.
    N, size_in, size_out = 256, 32, 64
    x = jax.random.normal(kx, (N, size_in), jnp.float32)
    params = init_params(kp, size_in, size_out)

    out = jax.block_until_ready(resnet_block_fc(x, params))
    ref = reference(x, params)
    assert out.shape == (N, size_out)
    assert jnp.allclose(out, ref, atol=1e-5, rtol=1e-5), "mismatch vs reference (f32)"

    # Identity-shortcut variant (size_in == size_out).
    params_id = init_params(jax.random.PRNGKey(1), size_in)
    out_id = jax.block_until_ready(resnet_block_fc(x, params_id))
    assert out_id.shape == (N, size_in)
    assert jnp.allclose(out_id, reference(x, params_id), atol=1e-5, rtol=1e-5), \
        "mismatch vs reference (identity)"

    # bf16 operand fast path (memory-bound win); f32 accumulation keeps error small.
    out_bf16 = jax.block_until_ready(
        resnet_block_fc(x, params, compute_dtype=jnp.bfloat16))
    assert out_bf16.dtype == jnp.bfloat16
    assert jnp.allclose(out_bf16.astype(jnp.float32), ref, atol=1e-1, rtol=5e-2), \
        "mismatch vs reference (bf16)"

    # Batch size not a multiple of the tile -> padded tail path, multi-step grid.
    x_odd = jax.random.normal(kx, (100, size_in), jnp.float32)
    out_odd = jax.block_until_ready(resnet_block_fc(x_odd, params, block_n=64))
    assert out_odd.shape == (100, size_out)
    assert jnp.allclose(out_odd, reference(x_odd, params), atol=1e-5, rtol=1e-5), \
        "mismatch vs reference (ragged batch)"

    print("KERNEL_OK")
</pallas_src>

<mosaic_0001>
module attributes {stable_mosaic.version = 11 : i64} {
  func.func @_resblock_kernel_shortcut(%arg0: i32, %arg1: memref<256x128xf32, #tpu.memory_space<vmem>>, %arg2: memref<128x128xf32, #tpu.memory_space<vmem>>, %arg3: memref<1x128xf32, #tpu.memory_space<vmem>>, %arg4: memref<128x128xf32, #tpu.memory_space<vmem>>, %arg5: memref<1x128xf32, #tpu.memory_space<vmem>>, %arg6: memref<128x128xf32, #tpu.memory_space<vmem>>, %arg7: memref<256x128xf32, #tpu.memory_space<vmem>>) attributes {dimension_semantics = [#tpu.dimension_semantics<parallel>], iteration_bounds = array<i64: 1>, scalar_prefetch = 0 : i64, scratch_operands = 0 : i64, tpu.core_type = #tpu.core_type<tc>, window_params = [{transform_indices = @transform_0, window_bounds = array<i64: 256, 128>}, {pipeline_mode = #tpu.pipeline_mode<synchronous>, transform_indices = @transform_1, window_bounds = array<i64: 128, 128>}, {pipeline_mode = #tpu.pipeline_mode<synchronous>, transform_indices = @transform_2, window_bounds = array<i64: 1, 128>}, {pipeline_mode = #tpu.pipeline_mode<synchronous>, transform_indices = @transform_3, window_bounds = array<i64: 128, 128>}, {pipeline_mode = #tpu.pipeline_mode<synchronous>, transform_indices = @transform_4, window_bounds = array<i64: 1, 128>}, {pipeline_mode = #tpu.pipeline_mode<synchronous>, transform_indices = @transform_5, window_bounds = array<i64: 128, 128>}, {transform_indices = @transform_6, window_bounds = array<i64: 256, 128>}]} {
    %c0 = arith.constant 0 : index
    %c0_0 = arith.constant 0 : index
    %0 = vector.load %arg1[%c0, %c0_0] : memref<256x128xf32, #tpu.memory_space<vmem>>, vector<256x128xf32>
    %cst = arith.constant 0.000000e+00 : f32
    %1 = vector.broadcast %cst : f32 to vector<256x128xf32>
    %2 = arith.maximumf %0, %1 : vector<256x128xf32>
    %c0_1 = arith.constant 0 : index
    %c0_2 = arith.constant 0 : index
    %3 = vector.load %arg2[%c0_1, %c0_2] : memref<128x128xf32, #tpu.memory_space<vmem>>, vector<128x128xf32>
    %cst_3 = arith.constant dense<0.000000e+00> : vector<256x128xf32>
    %4 = tpu.matmul %2, %3, %cst_3 {dimension_numbers = #tpu.dot_dimension_numbers<[1], [0], [0], [1], [0, 0, 1, 1], [], []>} : vector<256x128xf32>, vector<128x128xf32>, vector<256x128xf32> -> vector<256x128xf32>
    %c0_4 = arith.constant 0 : index
    %c0_5 = arith.constant 0 : index
    %5 = vector.load %arg3[%c0_4, %c0_5] : memref<1x128xf32, #tpu.memory_space<vmem>>, vector<1x128xf32>
    %6 = vector.broadcast %5 : vector<1x128xf32> to vector<256x128xf32>
    %7 = arith.addf %4, %6 : vector<256x128xf32>
    %cst_6 = arith.constant 0.000000e+00 : f32
    %8 = vector.broadcast %cst_6 : f32 to vector<256x128xf32>
    %9 = arith.maximumf %7, %8 : vector<256x128xf32>
    %c0_7 = arith.constant 0 : index
    %c0_8 = arith.constant 0 : index
    %10 = vector.load %arg4[%c0_7, %c0_8] : memref<128x128xf32, #tpu.memory_space<vmem>>, vector<128x128xf32>
    %cst_9 = arith.constant dense<0.000000e+00> : vector<256x128xf32>
    %11 = tpu.matmul %9, %10, %cst_9 {dimension_numbers = #tpu.dot_dimension_numbers<[1], [0], [0], [1], [0, 0, 1, 1], [], []>} : vector<256x128xf32>, vector<128x128xf32>, vector<256x128xf32> -> vector<256x128xf32>
    %c0_10 = arith.constant 0 : index
    %c0_11 = arith.constant 0 : index
    %12 = vector.load %arg5[%c0_10, %c0_11] : memref<1x128xf32, #tpu.memory_space<vmem>>, vector<1x128xf32>
    %13 = vector.broadcast %12 : vector<1x128xf32> to vector<256x128xf32>
    %14 = arith.addf %11, %13 : vector<256x128xf32>
    %c0_12 = arith.constant 0 : index
    %c0_13 = arith.constant 0 : index
    %15 = vector.load %arg6[%c0_12, %c0_13] : memref<128x128xf32, #tpu.memory_space<vmem>>, vector<128x128xf32>
    %cst_14 = arith.constant dense<0.000000e+00> : vector<256x128xf32>
    %16 = tpu.matmul %0, %15, %cst_14 {dimension_numbers = #tpu.dot_dimension_numbers<[1], [0], [0], [1], [0, 0, 1, 1], [], []>} : vector<256x128xf32>, vector<128x128xf32>, vector<256x128xf32> -> vector<256x128xf32>
    %17 = arith.addf %16, %14 : vector<256x128xf32>
    %c0_15 = arith.constant 0 : index
    %c0_16 = arith.constant 0 : index
    %18 = vector.load %arg7[%c0_15, %c0_16] : memref<256x128xf32, #tpu.memory_space<vmem>>, vector<256x128xf32>
    tpu.vector_store %arg7[%c0_15, %c0_16], %17 {strides = array<i32>} : memref<256x128xf32, #tpu.memory_space<vmem>>, vector<256x128xf32>,
    return
  }
  func.func @transform_0(%arg0: i32) -> (i32, i32) {
    %c0_i32 = arith.constant 0 : i32
    %c0_i32_0 = arith.constant 0 : i32
    return %arg0, %c0_i32 : i32, i32
  }
  func.func @transform_1(%arg0: i32) -> (i32, i32) {
    %c0_i32 = arith.constant 0 : i32
    %c0_i32_0 = arith.constant 0 : i32
    %c0_i32_1 = arith.constant 0 : i32
    return %c0_i32, %c0_i32_0 : i32, i32
  }
  func.func @transform_2(%arg0: i32) -> (i32, i32) {
    %c0_i32 = arith.constant 0 : i32
    %c0_i32_0 = arith.constant 0 : i32
    %c0_i32_1 = arith.constant 0 : i32
    return %c0_i32, %c0_i32_0 : i32, i32
  }
  func.func @transform_3(%arg0: i32) -> (i32, i32) {
    %c0_i32 = arith.constant 0 : i32
    %c0_i32_0 = arith.constant 0 : i32
    %c0_i32_1 = arith.constant 0 : i32
    return %c0_i32, %c0_i32_0 : i32, i32
  }
  func.func @transform_4(%arg0: i32) -> (i32, i32) {
    %c0_i32 = arith.constant 0 : i32
    %c0_i32_0 = arith.constant 0 : i32
    %c0_i32_1 = arith.constant 0 : i32
    return %c0_i32, %c0_i32_0 : i32, i32
  }
  func.func @transform_5(%arg0: i32) -> (i32, i32) {
    %c0_i32 = arith.constant 0 : i32
    %c0_i32_0 = arith.constant 0 : i32
    %c0_i32_1 = arith.constant 0 : i32
    return %c0_i32, %c0_i32_0 : i32, i32
  }
  func.func @transform_6(%arg0: i32) -> (i32, i32) {
    %c0_i32 = arith.constant 0 : i32
    %c0_i32_0 = arith.constant 0 : i32
    return %arg0, %c0_i32 : i32, i32
  }
}

</mosaic_0001>

<bundles_post_ra>
// kernel: tpu_custom_call.1
= control target key start
LH: loop header
LB: loop body
LE: loop exit
PB: predicated region body
PF: predicated region fallthrough
CT: control target
= control target key end

     0   :  { %11 = vsyncpa [#allocation3], 0  ;;  %s1794_s0 = inlined_call_operand.hbm [shape: f32[256,128], index: 0, kind: input, shape index: {}]   ;;  %s1795_s1 = inlined_call_operand.hbm [shape: f32[128,128], index: 1, kind: input, shape index: {}]   ;;  %s1796_s2 = inlined_call_operand.vmem [shape: f32[1,128], index: 2, kind: input, shape index: {}]   ;;  %s1797_s3 = inlined_call_operand.hbm [shape: f32[128,128], index: 3, kind: input, shape index: {}]   ;;  %s1798_s4 = inlined_call_operand.vmem [shape: f32[1,128], index: 4, kind: input, shape index: {}]   ;;  %s1799_s5 = inlined_call_operand.hbm [shape: f32[128,128], index: 5, kind: input, shape index: {}]   ;;  %s1800_s6 = inlined_call_operand.hbm [shape: f32[256,128], index: 6, kind: output, shape index: {}]  }
   0x1   :  { %12 = vsyncpa [#allocation6], 0 }
   0x2   :  { %13 = vsyncpa [#allocation9], 0 }
   0x3   :  { %14 = vsyncpa [#allocation4], 0  ;;  %s1496_s21 = smov [#allocation5]   ;;  %s1497_s23 = smov [#allocation2]  }
   0x4   :  { %s32_s22 = sshll.u32 %s1496_s21, 4  ;;  %s20_s24 = sshll.u32 %s1497_s23, 4  ;;  %s33_s22 = int_to_ptr.vmem [resolvable:$true] %s32_s22  ;;  %s21_s24 = int_to_ptr.vmem [resolvable:$true] %s20_s24 }
   0x5   :  { %s1396_s25 = scalar_lea.vmem %s33_s22, 2048  ;;  %p1401_p1 = scmp.lt.s32.totalorder %s33_s22, %s33_s22 }
   0x6   :  { %p1397_p0 = scmp.ne.s32.totalorder %s33_s22, %s1396_s25  ;;  %p1402_p2 = scmp.lt.s32.totalorder %s1396_s25, %s1396_s25 }
   0x8   :  { %p1403_p3 = por %p1402_p2, %p1401_p1 }
   0xa   :  { %p1404_p4 = pnand %p1403_p3, %p1397_p0 }
   0xc   :  { %1407 = shalt.err (!%p1404_p4)
}
   0xd   :  { %s1498_s26 = smov 128   ;;  %s1499_s27 = smov 8  }
   0xe   :  { %38 = dma.hbm_to_vmem [thread:$0]  %s1795_s1, 2048, %s33_s22, [#allocation6], %s1498_s26, %s1498_s26, %s1499_s27  }
   0xf   :  { %s1416_s30 = scalar_lea.vmem %s21_s24, 4096  ;;  %p1421_p6 = scmp.lt.s32.totalorder %s21_s24, %s21_s24 }
  0x10   :  { %p1417_p5 = scmp.ne.s32.totalorder %s21_s24, %s1416_s30  ;;  %p1422_p7 = scmp.lt.s32.totalorder %s1416_s30, %s1416_s30 }
  0x12   :  { %p1423_p8 = por %p1422_p7, %p1421_p6 }
  0x14   :  { %p1424_p9 = pnand %p1423_p8, %p1417_p5 }
  0x16   :  { %1427 = shalt.err (!%p1424_p9)
}
  0x17   :  { %26 = dma.hbm_to_vmem [thread:$0]  %s1794_s0, 4096, %s21_s24, [#allocation3], %s1498_s26, %s1498_s26, %s1499_s27  }
  0x18   :  { %s1500_s9 = smov [#allocation7]   ;;  %s1501_s11 = smov [#allocation8]  }
  0x19   :  { %s46_s10 = sshll.u32 %s1500_s9, 4  ;;  %s60_s12 = sshll.u32 %s1501_s11, 4  ;;  %s47_s10 = int_to_ptr.vmem [resolvable:$true] %s46_s10  ;;  %s61_s12 = int_to_ptr.vmem [resolvable:$true] %s60_s12 }
  0x1a   :  { %s1436_s1 = scalar_lea.vmem %s47_s10, 2048  ;;  %p1441_p11 = scmp.lt.s32.totalorder %s47_s10, %s47_s10 }
  0x1b   :  { %p1437_p10 = scmp.ne.s32.totalorder %s47_s10, %s1436_s1  ;;  %p1442_p12 = scmp.lt.s32.totalorder %s1436_s1, %s1436_s1 }
  0x1d   :  { %p1443_p13 = por %p1442_p12, %p1441_p11 }
  0x1f   :  { %p1444_p0 = pnand %p1443_p13, %p1437_p10 }
  0x21   :  { %1447 = shalt.err (!%p1444_p0)
}
  0x22   :  { %52 = dma.hbm_to_vmem [thread:$0]  %s1797_s3, 2048, %s47_s10, [#allocation6], %s1498_s26, %s1498_s26, %s1499_s27  }
  0x23   :  { %s1456_s0 = scalar_lea.vmem %s61_s12, 2048  ;;  %p1461_p2 = scmp.lt.s32.totalorder %s61_s12, %s61_s12 }
  0x24   :  { %p1457_p1 = scmp.ne.s32.totalorder %s61_s12, %s1456_s0  ;;  %p1462_p3 = scmp.lt.s32.totalorder %s1456_s0, %s1456_s0 }
  0x26   :  { %p1463_p4 = por %p1462_p3, %p1461_p2 }
  0x28   :  { %p1464_p5 = pnand %p1463_p4, %p1457_p1 }
  0x2a   :  { %1467 = shalt.err (!%p1464_p5)
}
  0x2b   :  { %66 = dma.hbm_to_vmem [thread:$0]  %s1799_s5, 2048, %s61_s12, [#allocation9], %s1498_s26, %s1498_s26, %s1499_s27  }
  0x2c   :  { %1488 = dma.done.wait [#allocation3], 4096  }
  0x2d   :  { %1489 = vsyncadd [#allocation3], 4294963200 }
  0x2e   :  { %1490 = dma.done.wait [#allocation6], 4096  }
  0x2f   :  { %1491 = vsyncadd [#allocation6], 4294963200 }
  0x30   :  { %1492 = dma.done.wait [#allocation9], 2048  }
  0x31   :  { %1493 = vsyncadd [#allocation9], 4294965248  ;;  %v158_v0 = vld [vmem:[#allocation5 + $0x78] sm:$0xff]  ;;  %v157_v1 = vld [vmem:[#allocation5 + $0x70] sm:$0xff] }
  0x32   :  { %1109 = vmatprep.subr.mxu0 %v158_v0  ;;  %1349 = vmatprep.subr.mxu1 %v158_v0  ;;  %v156_v2 = vld [vmem:[#allocation5 + $0x68] sm:$0xff]  ;;  %v155_v3 = vld [vmem:[#allocation5 + $0x60] sm:$0xff]  ;;  %v154_v5 = vld [vmem:[#allocation5 + $0x58] sm:$0xff] }
  0x33   :  { %1110 = vmatpush3.msra.mxu0 %v158_v0  ;;  %1365 = vmatpush3.msra.mxu1 %v158_v0  ;;  %v1562_v4 = vld [vmem:[#allocation2] sm:$0xff]  ;;  %v153_v7 = vld [vmem:[#allocation5 + $0x50] sm:$0xff]  ;;  %v152_v8 = vld [vmem:[#allocation5 + $0x48] sm:$0xff] }
  0x34   :  { %1111 = vmatprep.subr.mxu0 %v157_v1  ;;  %1350 = vmatprep.subr.mxu1 %v157_v1  ;;  %v111_v6 = vmax.f32 %v1562_v4, 0.0  ;;  %v151_v9 = vld [vmem:[#allocation5 + $0x40] sm:$0xff]  ;;  %v150_v10 = vld [vmem:[#allocation5 + $0x38] sm:$0xff]  ;;  %v149_v11 = vld [vmem:[#allocation5 + $0x30] sm:$0xff] }
  0x35   :  { %1112 = vmatpush3.msra.mxu0 %v157_v1  ;;  %1366 = vmatpush3.msra.mxu1 %v157_v1  ;;  %v148_v12 = vld [vmem:[#allocation5 + $0x28] sm:$0xff]  ;;  %v147_v13 = vld [vmem:[#allocation5 + $0x20] sm:$0xff]  ;;  %v146_v14 = vld [vmem:[#allocation5 + $0x18] sm:$0xff] }
  0x36   :  { %1113 = vmatprep.subr.mxu0 %v156_v2  ;;  %1351 = vmatprep.subr.mxu1 %v156_v2  ;;  %v145_v15 = vld [vmem:[#allocation5 + $0x10] sm:$0xff]  ;;  %v144_v16 = vld [vmem:[#allocation5 + $0x8] sm:$0xff]  ;;  %v1569_v19 = vld [vmem:[#allocation2 + $0x80] sm:$0xff] }
  0x37   :  { %1114 = vmatpush3.msra.mxu0 %v156_v2  ;;  %1367 = vmatpush3.msra.mxu1 %v156_v2  ;;  %v1565_v17 = vld [vmem:[#allocation2 + $0x8] sm:$0xff]  ;;  %v1567_v18 = vld [vmem:[#allocation2 + $0x10] sm:$0xff]  ;;  %v143_v20 = vld [vmem:[#allocation5] sm:$0xff]  ;;  %v127_v26 = vmax.f32 %v1569_v19, 0.0 }
  0x38   :  { %1115 = vmatprep.subr.mxu0 %v155_v3  ;;  %1352 = vmatprep.subr.mxu1 %v155_v3  ;;  %v1571_v21 = vld [vmem:[#allocation2 + $0x88] sm:$0xff]  ;;  %v112_v22 = vmax.f32 %v1565_v17, 0.0  ;;  %v1574_v23 = vld [vmem:[#allocation2 + $0x90] sm:$0xff]  ;;  %v113_v24 = vmax.f32 %v1567_v18, 0.0  ;;  %v1577_v25 = vld [vmem:[#allocation2 + $0x18] sm:$0xff] }
  0x39   :  { %1116 = vmatpush3.msra.mxu0 %v155_v3  ;;  %1141 = vmatprep.mubr.f32.mxu0 %v111_v6  ;;  %v1580_v27 = vld [vmem:[#allocation2 + $0x20] sm:$0xff]  ;;  %v128_v28 = vmax.f32 %v1571_v21, 0.0  ;;  %v129_v29 = vmax.f32 %v1574_v23, 0.0  ;;  %v1584_v30 = vld [vmem:[#allocation2 + $0x98] sm:$0xff]  ;;  %v114_v32 = vmax.f32 %v1577_v25, 0.0  ;;  %v1590_v35 = vld [vmem:[#allocation2 + $0x28] sm:$0xff] }
  0x3a   :  { %1117 = vmatprep.subr.mxu0 %v154_v5  ;;  %1368 = vmatpush3.msra.mxu1 %v155_v3  ;;  %v438_v31 = vld [vmem:[#allocation7 + $0x78] sm:$0xff]  ;;  %v1587_v33 = vld [vmem:[#allocation2 + $0xa0] sm:$0xff]  ;;  %v115_v34 = vmax.f32 %v1580_v27, 0.0  ;;  %v1592_v37 = vld [vmem:[#allocation2 + $0x30] sm:$0xff]  ;;  %v130_v38 = vmax.f32 %v1584_v30, 0.0  ;;  %v116_v42 = vmax.f32 %v1590_v35, 0.0 }
  0x3b   :  { %1118 = vmatpush3.msra.mxu0 %v154_v5  ;;  %1353 = vmatprep.subr.mxu1 %v154_v5  ;;  %v686_v36 = vld [vmem:[#allocation8 + $0x78] sm:$0xff]  ;;  %v437_v39 = vld [vmem:[#allocation7 + $0x70] sm:$0xff]  ;;  %v131_v40 = vmax.f32 %v1587_v33, 0.0  ;;  %v1596_v41 = vld [vmem:[#allocation2 + $0xa8] sm:$0xff]  ;;  %v117_v44 = vmax.f32 %v1592_v37, 0.0 }
  0x3c   :  { %1119 = vmatprep.subr.mxu0 %v153_v7  ;;  %1369 = vmatpush3.msra.mxu1 %v154_v5  ;;  %v1599_v43 = vld [vmem:[#allocation2 + $0xb0] sm:$0xff]  ;;  %v1602_v45 = vld [vmem:[#allocation2 + $0x38] sm:$0xff]  ;;  %v1604_v47 = vld [vmem:[#allocation2 + $0x40] sm:$0xff]  ;;  %v132_v48 = vmax.f32 %v1596_v41, 0.0 }
  0x3d   :  { %1120 = vmatpush3.msra.mxu0 %v153_v7  ;;  %1354 = vmatprep.subr.mxu1 %v153_v7  ;;  %v685_v46 = vld [vmem:[#allocation8 + $0x70] sm:$0xff]  ;;  %v436_v49 = vld [vmem:[#allocation7 + $0x68] sm:$0xff]  ;;  %v133_v50 = vmax.f32 %v1599_v43, 0.0  ;;  %v1608_v51 = vld [vmem:[#allocation2 + $0xb8] sm:$0xff]  ;;  %v118_v52 = vmax.f32 %v1602_v45, 0.0  ;;  %v119_v54 = vmax.f32 %v1604_v47, 0.0 }
  0x3e   :  { %1121 = vmatprep.subr.mxu0 %v152_v8  ;;  %1370 = vmatpush3.msra.mxu1 %v153_v7  ;;  %v1611_v53 = vld [vmem:[#allocation2 + $0xc0] sm:$0xff]  ;;  %v1614_v55 = vld [vmem:[#allocation2 + $0x48] sm:$0xff]  ;;  %v1616_v57 = vld [vmem:[#allocation2 + $0x50] sm:$0xff]  ;;  %v134_v58 = vmax.f32 %v1608_v51, 0.0 }
  0x3f   :  { %1122 = vmatpush3.msra.mxu0 %v152_v8  ;;  %1355 = vmatprep.subr.mxu1 %v152_v8  ;;  %v684_v56 = vld [vmem:[#allocation8 + $0x68] sm:$0xff]  ;;  %v435_v59 = vld [vmem:[#allocation7 + $0x60] sm:$0xff]  ;;  %v135_v60 = vmax.f32 %v1611_v53, 0.0  ;;  %v120_v62 = vmax.f32 %v1614_v55, 0.0  ;;  %v1623_v63 = vld [vmem:[#allocation2 + $0xd0] sm:$0xff]  ;;  %v121_v0 = vmax.f32 %v1616_v57, 0.0 }
  0x40   :  { %1123 = vmatprep.subr.mxu0 %v151_v9  ;;  %1371 = vmatpush3.msra.mxu1 %v152_v8  ;;  %v1620_v61 = vld [vmem:[#allocation2 + $0xc8] sm:$0xff]  ;;  %v1626_v1 = vld [vmem:[#allocation2 + $0x58] sm:$0xff]  ;;  %v683_v2 = vld [vmem:[#allocation8 + $0x60] sm:$0xff]  ;;  %v137_v7 = vmax.f32 %v1623_v63, 0.0 }
  0x41   :  { %1124 = vmatpush3.msra.mxu0 %v151_v9  ;;  %1356 = vmatprep.subr.mxu1 %v151_v9  ;;  %v1628_v3 = vld [vmem:[#allocation2 + $0x60] sm:$0xff]  ;;  %v136_v5 = vmax.f32 %v1620_v61, 0.0  ;;  %v434_v6 = vld [vmem:[#allocation7 + $0x58] sm:$0xff] }
  0x42   :  { %1125 = vmatprep.subr.mxu0 %v150_v10  ;;  %1372 = vmatpush3.msra.mxu1 %v151_v9  ;;  %v1632_v8 = vld [vmem:[#allocation2 + $0xd8] sm:$0xff]  ;;  %v122_v9 = vmax.f32 %v1626_v1, 0.0 }
  0x43   :  { %1126 = vmatpush3.msra.mxu0 %v150_v10  ;;  %1357 = vmatprep.subr.mxu1 %v150_v10 }
  0x44   :  { %1127 = vmatprep.subr.mxu0 %v149_v11  ;;  %1373 = vmatpush3.msra.mxu1 %v150_v10  ;;  %v1635_v10 = vld [vmem:[#allocation2 + $0xe0] sm:$0xff] }
  0x45   :  { %1128 = vmatpush3.msra.mxu0 %v149_v11  ;;  %1358 = vmatprep.subr.mxu1 %v149_v11 }
  0x46   :  { %1129 = vmatprep.subr.mxu0 %v148_v12  ;;  %1374 = vmatpush3.msra.mxu1 %v149_v11  ;;  %v123_v11 = vmax.f32 %v1628_v3, 0.0 }
  0x47   :  { %1130 = vmatpush3.msra.mxu0 %v148_v12  ;;  %1359 = vmatprep.subr.mxu1 %v148_v12 }
  0x48   :  { %1131 = vmatprep.subr.mxu0 %v147_v13  ;;  %1375 = vmatpush3.msra.mxu1 %v148_v12  ;;  %v1638_v12 = vld [vmem:[#allocation2 + $0x68] sm:$0xff] }
  0x49   :  { %1132 = vmatpush3.msra.mxu0 %v147_v13  ;;  %1360 = vmatprep.subr.mxu1 %v147_v13 }
  0x4a   :  { %1133 = vmatprep.subr.mxu0 %v146_v14  ;;  %1376 = vmatpush3.msra.mxu1 %v147_v13  ;;  %v682_v13 = vld [vmem:[#allocation8 + $0x58] sm:$0xff] }
  0x4b   :  { %1134 = vmatpush3.msra.mxu0 %v146_v14  ;;  %1361 = vmatprep.subr.mxu1 %v146_v14 }
  0x4c   :  { %1135 = vmatprep.subr.mxu0 %v145_v15  ;;  %1377 = vmatpush3.msra.mxu1 %v146_v14  ;;  %v1640_v14 = vld [vmem:[#allocation2 + $0x70] sm:$0xff] }
  0x4d   :  { %1136 = vmatpush3.msra.mxu0 %v145_v15  ;;  %1362 = vmatprep.subr.mxu1 %v145_v15 }
  0x4e   :  { %1137 = vmatprep.subr.mxu0 %v144_v16  ;;  %1378 = vmatpush3.msra.mxu1 %v145_v15  ;;  %v138_v15 = vmax.f32 %v1632_v8, 0.0 }
  0x4f   :  { %1138 = vmatpush3.msra.mxu0 %v144_v16  ;;  %1363 = vmatprep.subr.mxu1 %v144_v16 }
  0x50   :  { %1139 = vmatprep.subr.mxu0 %v143_v20  ;;  %1379 = vmatpush3.msra.mxu1 %v144_v16  ;;  %v433_v16 = vld [vmem:[#allocation7 + $0x50] sm:$0xff] }
  0x51   :  { %1140 = vmatpush3.msra.mxu0 %v143_v20  ;;  %1364 = vmatprep.subr.mxu1 %v143_v20 }
  0x52   :  { %1142 = vmatmul.mubr.f32.vlgmr.msra.gmra.mxu0 %v112_v22  ;;  %1380 = vmatpush3.msra.mxu1 %v143_v20  ;;  %v139_v20 = vmax.f32 %v1635_v10, 0.0  ;;  %v1644_v22 = vld [vmem:[#allocation2 + $0xe8] sm:$0xff] }
  0x53   :  { %1144 = vmatprep.mubr.f32.mxu0 %v113_v24  ;;  %1165 = vmatprep.mubr.f32.mxu1 %v127_v26  ;;  %v124_v24 = vmax.f32 %v1638_v12, 0.0  ;;  %v1647_v26 = vld [vmem:[#allocation2 + $0xf0] sm:$0xff] }
  0x54   :  { %1166 = vmatmul.mubr.f32.vlgmr.msra.gmra.mxu1 %v128_v28  ;;  %1189 = vmatprep.subr.mxu1 %v438_v31  ;;  %v125_v28 = vmax.f32 %v1640_v14, 0.0 }
  0x55   :  { %1168 = vmatprep.mubr.f32.mxu1 %v129_v29  ;;  %1190 = vmatpush3.msra.mxu1 %v438_v31  ;;  %v1650_v29 = vld [vmem:[#allocation2 + $0x78] sm:$0xff]  ;;  %v681_v31 = vld [vmem:[#allocation8 + $0x50] sm:$0xff] }
  0x56   :  { %1145 = vmatmul.mubr.f32.gmra.mxu0 %v114_v32  ;;  %1269 = vmatprep.subr.mxu0 %v686_v36  ;;  %v140_v32 = vmax.f32 %v1644_v22, 0.0 }
  0x57   :  { %1147 = vmatprep.mubr.f32.mxu0 %v115_v34  ;;  %1191 = vmatprep.subr.mxu1 %v437_v39  ;;  %v432_v34 = vld [vmem:[#allocation7 + $0x48] sm:$0xff] }
  0x58   :  { %1169 = vmatmul.mubr.f32.gmra.mxu1 %v130_v38  ;;  %1270 = vmatpush3.msra.mxu0 %v686_v36  ;;  %v141_v36 = vmax.f32 %v1647_v26, 0.0  ;;  %v1654_v38 = vld [vmem:[#allocation2 + $0xf8] sm:$0xff] }
  0x59   :  { %1171 = vmatprep.mubr.f32.mxu1 %v131_v40  ;;  %1192 = vmatpush3.msra.mxu1 %v437_v39  ;;  %v126_v39 = vmax.f32 %v1650_v29, 0.0  ;;  %v680_v40 = vld [vmem:[#allocation8 + $0x48] sm:$0xff] }
  0x5a   :  { %1148 = vmatmul.mubr.f32.gmra.mxu0 %v116_v42  ;;  %1271 = vmatprep.subr.mxu0 %v685_v46  ;;  %v142_v42 = vmax.f32 %v1654_v38, 0.0 }
  0x5b   :  { %1150 = vmatprep.mubr.f32.mxu0 %v117_v44  ;;  %1193 = vmatprep.subr.mxu1 %v436_v49  ;;  %v431_v44 = vld [vmem:[#allocation7 + $0x40] sm:$0xff] }
  0x5c   :  { %1172 = vmatmul.mubr.f32.gmra.mxu1 %v132_v48  ;;  %1272 = vmatpush3.msra.mxu0 %v685_v46  ;;  %v679_v46 = vld [vmem:[#allocation8 + $0x40] sm:$0xff]  ;;  %v430_v48 = vld [vmem:[#allocation7 + $0x38] sm:$0xff] }
  0x5d   :  { %1174 = vmatprep.mubr.f32.mxu1 %v133_v50  ;;  %1194 = vmatpush3.msra.mxu1 %v436_v49  ;;  %v678_v49 = vld [vmem:[#allocation8 + $0x38] sm:$0xff]  ;;  %v429_v50 = vld [vmem:[#allocation7 + $0x30] sm:$0xff] }
  0x5e   :  { %1151 = vmatmul.mubr.f32.gmra.mxu0 %v118_v52  ;;  %1273 = vmatprep.subr.mxu0 %v684_v56  ;;  %v677_v52 = vld [vmem:[#allocation8 + $0x30] sm:$0xff] }
  0x5f   :  { %1153 = vmatprep.mubr.f32.mxu0 %v119_v54  ;;  %1195 = vmatprep.subr.mxu1 %v435_v59  ;;  %v428_v54 = vld [vmem:[#allocation7 + $0x28] sm:$0xff] }
  0x60   :  { %1175 = vmatmul.mubr.f32.gmra.mxu1 %v134_v58  ;;  %1274 = vmatpush3.msra.mxu0 %v684_v56  ;;  %v676_v56 = vld [vmem:[#allocation8 + $0x28] sm:$0xff]  ;;  %v427_v58 = vld [vmem:[#allocation7 + $0x20] sm:$0xff] }
  0x61   :  { %1177 = vmatprep.mubr.f32.mxu1 %v135_v60  ;;  %1196 = vmatpush3.msra.mxu1 %v435_v59  ;;  %v675_v59 = vld [vmem:[#allocation8 + $0x20] sm:$0xff]  ;;  %v426_v60 = vld [vmem:[#allocation7 + $0x18] sm:$0xff] }
  0x62   :  { %1154 = vmatmul.mubr.f32.gmra.mxu0 %v120_v62  ;;  %1275 = vmatprep.subr.mxu0 %v683_v2  ;;  %v674_v62 = vld [vmem:[#allocation8 + $0x18] sm:$0xff] }
  0x63   :  { %1156 = vmatprep.mubr.f32.mxu0 %v121_v0  ;;  %1197 = vmatprep.subr.mxu1 %v434_v6  ;;  %v425_v0 = vld [vmem:[#allocation7 + $0x10] sm:$0xff] }
  0x64   :  { %1178 = vmatmul.mubr.f32.gmra.mxu1 %v136_v5  ;;  %1276 = vmatpush3.msra.mxu0 %v683_v2  ;;  %v673_v2 = vld [vmem:[#allocation8 + $0x10] sm:$0xff]  ;;  %v424_v5 = vld [vmem:[#allocation7 + $0x8] sm:$0xff] }
  0x65   :  { %1180 = vmatprep.mubr.f32.mxu1 %v137_v7  ;;  %1198 = vmatpush3.msra.mxu1 %v434_v6  ;;  %v672_v6 = vld [vmem:[#allocation8 + $0x8] sm:$0xff]  ;;  %v423_v7 = vld [vmem:[#allocation7] sm:$0xff] }
  0x66   :  { %1157 = vmatmul.mubr.f32.gmra.mxu0 %v122_v9  ;;  %1277 = vmatprep.subr.mxu0 %v682_v13  ;;  %v671_v9 = vld [vmem:[#allocation8] sm:$0xff] }
  0x67   :  { %1159 = vmatprep.mubr.f32.mxu0 %v123_v11  ;;  %1199 = vmatprep.subr.mxu1 %v433_v16 }
  0x68   :  { %1181 = vmatmul.mubr.f32.gmra.mxu1 %v138_v15  ;;  %1278 = vmatpush3.msra.mxu0 %v682_v13 }
  0x69   :  { %1183 = vmatprep.mubr.f32.mxu1 %v139_v20  ;;  %1200 = vmatpush3.msra.mxu1 %v433_v16 }
  0x6a   :  { %1160 = vmatmul.mubr.f32.gmra.mxu0 %v124_v24  ;;  %1279 = vmatprep.subr.mxu0 %v681_v31 }
  0x6b   :  { %1162 = vmatprep.mubr.f32.mxu0 %v125_v28  ;;  %1201 = vmatprep.subr.mxu1 %v432_v34 }
  0x6c   :  { %1184 = vmatmul.mubr.f32.gmra.mxu1 %v140_v32  ;;  %1280 = vmatpush3.msra.mxu0 %v681_v31 }
  0x6d   :  { %1186 = vmatprep.mubr.f32.mxu1 %v141_v36  ;;  %1202 = vmatpush3.msra.mxu1 %v432_v34 }
  0x6e   :  { %1163 = vmatmul.mubr.f32.gmra.mxu0 %v126_v39  ;;  %1281 = vmatprep.subr.mxu0 %v680_v40 }
  0x6f   :  { %1203 = vmatprep.subr.mxu1 %v431_v44  ;;  %1282 = vmatpush3.msra.mxu0 %v680_v40 }
  0x70   :  { %1187 = vmatmul.mubr.f32.gmra.mxu1 %v142_v42  ;;  %1283 = vmatprep.subr.mxu0 %v679_v46 }
  0x71   :  { %1204 = vmatpush3.msra.mxu1 %v431_v44  ;;  %1284 = vmatpush3.msra.mxu0 %v679_v46 }
  0x72   :  { %1205 = vmatprep.subr.mxu1 %v430_v48  ;;  %1285 = vmatprep.subr.mxu0 %v678_v49 }
  0x73   :  { %1206 = vmatpush3.msra.mxu1 %v430_v48  ;;  %1286 = vmatpush3.msra.mxu0 %v678_v49 }
  0x74   :  { %1207 = vmatprep.subr.mxu1 %v429_v50  ;;  %1287 = vmatprep.subr.mxu0 %v677_v52 }
  0x75   :  { %1208 = vmatpush3.msra.mxu1 %v429_v50  ;;  %1288 = vmatpush3.msra.mxu0 %v677_v52 }
  0x76   :  { %1209 = vmatprep.subr.mxu1 %v428_v54  ;;  %1289 = vmatprep.subr.mxu0 %v676_v56 }
  0x77   :  { %1210 = vmatpush3.msra.mxu1 %v428_v54  ;;  %1290 = vmatpush3.msra.mxu0 %v676_v56 }
  0x78   :  { %1211 = vmatprep.subr.mxu1 %v427_v58  ;;  %1291 = vmatprep.subr.mxu0 %v675_v59 }
  0x79   :  { %1212 = vmatpush3.msra.mxu1 %v427_v58  ;;  %1292 = vmatpush3.msra.mxu0 %v675_v59 }
  0x7a   :  { %1213 = vmatprep.subr.mxu1 %v426_v60  ;;  %1301 = vmatprep.mubr.f32.mxu0 %v1562_v4  ;;  %v1693_v4 = vld [vmem:[%s1796_s2] ss:$0 sm:$0xff] }
  0x7b   :  { %1214 = vmatpush3.msra.mxu1 %v426_v60  ;;  %1293 = vmatprep.subr.mxu0 %v674_v62 }
  0x7c   :  { %1294 = vmatpush3.msra.mxu0 %v674_v62  ;;  %1215 = vmatprep.subr.mxu1 %v425_v0 }
  0x7d   :  { %1295 = vmatprep.subr.mxu0 %v673_v2  ;;  %1216 = vmatpush3.msra.mxu1 %v425_v0 }
  0x7e   :  { %1296 = vmatpush3.msra.mxu0 %v673_v2  ;;  %1217 = vmatprep.subr.mxu1 %v424_v5 }
  0x7f   :  { %1297 = vmatprep.subr.mxu0 %v672_v6  ;;  %1218 = vmatpush3.msra.mxu1 %v424_v5 }
  0x80   :  { %1298 = vmatpush3.msra.mxu0 %v672_v6  ;;  %1219 = vmatprep.subr.mxu1 %v423_v7 }
  0x81   :  { %1299 = vmatprep.subr.mxu0 %v671_v9  ;;  %1220 = vmatpush3.msra.mxu1 %v423_v7 }
  0x82   :  { %1300 = vmatpush3.msra.mxu0 %v671_v9 }
  0x83   :  { %1302 = vmatmul.mubr.f32.vlgmr.msra.gmra.mxu0 %v1565_v17 }
  0x84   :  { %1304 = vmatprep.mubr.f32.mxu0 %v1567_v18 }
  0x87   :  { %1305 = vmatmul.mubr.f32.gmra.mxu0 %v1577_v25 }
  0x88   :  { %1307 = vmatprep.mubr.f32.mxu0 %v1580_v27 }
  0x8b   :  { %1308 = vmatmul.mubr.f32.gmra.mxu0 %v1590_v35 }
  0x8c   :  { %1310 = vmatprep.mubr.f32.mxu0 %v1592_v37 }
  0x8f   :  { %1311 = vmatmul.mubr.f32.gmra.mxu0 %v1602_v45 }
  0x90   :  { %1313 = vmatprep.mubr.f32.mxu0 %v1604_v47 }
  0x93   :  { %1314 = vmatmul.mubr.f32.gmra.mxu0 %v1614_v55 }
  0x94   :  { %1316 = vmatprep.mubr.f32.mxu0 %v1616_v57 }
  0x97   :  { %1317 = vmatmul.mubr.f32.gmra.mxu0 %v1626_v1 }
  0x98   :  { %1319 = vmatprep.mubr.f32.mxu0 %v1628_v3 }
  0x9b   :  { %1320 = vmatmul.mubr.f32.gmra.mxu0 %v1638_v12 }
  0x9c   :  { %1322 = vmatprep.mubr.f32.mxu0 %v1640_v14 }
  0x9f   :  { %1323 = vmatmul.mubr.f32.gmra.mxu0 %v1650_v29 }
  0xa0   :  { %1325 = vmatprep.mubr.f32.mxu0 %v1569_v19 }
  0xa3   :  { %1326 = vmatmul.mubr.f32.gmra.mxu0 %v1571_v21 }
  0xa4   :  { %1328 = vmatprep.mubr.f32.mxu0 %v1574_v23 }
  0xa7   :  { %1329 = vmatmul.mubr.f32.gmra.mxu0 %v1584_v30 }
  0xa8   :  { %1331 = vmatprep.mubr.f32.mxu0 %v1587_v33 }
  0xab   :  { %1332 = vmatmul.mubr.f32.gmra.mxu0 %v1596_v41 }
  0xac   :  { %1334 = vmatprep.mubr.f32.mxu0 %v1599_v43 }
  0xaf   :  { %1335 = vmatmul.mubr.f32.gmra.mxu0 %v1608_v51 }
  0xb0   :  { %1337 = vmatprep.mubr.f32.mxu0 %v1611_v53 }
  0xb3   :  { %1338 = vmatmul.mubr.f32.gmra.mxu0 %v1620_v61 }
  0xb4   :  { %1340 = vmatprep.mubr.f32.mxu0 %v1623_v63 }
  0xb7   :  { %1341 = vmatmul.mubr.f32.gmra.mxu0 %v1632_v8 }
  0xb8   :  { %1343 = vmatprep.mubr.f32.mxu0 %v1635_v10 }
  0xbb   :  { %1344 = vmatmul.mubr.f32.gmra.mxu0 %v1644_v22 }
  0xbc   :  { %1346 = vmatprep.mubr.f32.mxu0 %v1647_v26 }
  0xbf   :  { %1347 = vmatmul.mubr.f32.gmra.mxu0 %v1654_v38 }
 0x112   :  { %v1143_v17 = vpop.f32.mrf.mxu0 }
 0x113   :  { %v238_v18 = vadd.f32 %v1143_v17, %v1693_v4 }
 0x114   :  { %v232_v19 = vpop.f32.mrf.mxu0  ;;  %v1696_v21 = vpop.f32.mrf.mxu1 }
 0x115   :  { %v233_v23 = vadd.f32 %v1693_v4, %v232_v19  ;;  %v392_v33 = vmax.f32 %v238_v18, 0.0  ;;  %v318_v7 = vadd.f32 %v1696_v21, %v1693_v4 }
 0x116   :  { %v1146_v25 = vpop.f32.mrf.mxu0  ;;  %v312_v27 = vpop.f32.mrf.mxu1 }
 0x117   :  { %v391_v30 = vmax.f32 %v233_v23, 0.0  ;;  %v248_v35 = vadd.f32 %v1146_v25, %v1693_v4  ;;  %v313_v54 = vadd.f32 %v1693_v4, %v312_v27  ;;  %v408_v19 = vmax.f32 %v318_v7, 0.0 }
 0x118   :  { %v242_v37 = vpop.f32.mrf.mxu0  ;;  %v1700_v41 = vpop.f32.mrf.mxu1 }
 0x119   :  { %v243_v43 = vadd.f32 %v1693_v4, %v242_v37  ;;  %1221 = vmatprep.mubr.f32.mxu1 %v391_v30  ;;  %v394_v53 = vmax.f32 %v248_v35, 0.0  ;;  %v407_v2 = vmax.f32 %v313_v54, 0.0  ;;  %v328_v23 = vadd.f32 %v1700_v41, %v1693_v4 }
 0x11a   :  { %v1149_v45 = vpop.f32.mrf.mxu0  ;;  %1222 = vmatmul.mubr.f32.vlgmr.msra.gmra.mxu1 %v392_v33  ;;  %v322_v47 = vpop.f32.mrf.mxu1 }
 0x11b   :  { %v393_v51 = vmax.f32 %v243_v43, 0.0  ;;  %v258_v55 = vadd.f32 %v1149_v45, %v1693_v4  ;;  %v323_v5 = vadd.f32 %v1693_v4, %v322_v47  ;;  %v410_v33 = vmax.f32 %v328_v23, 0.0 }
 0x11c   :  { %v252_v57 = vpop.f32.mrf.mxu0  ;;  %v1704_v61 = vpop.f32.mrf.mxu1 }
 0x11d   :  { %v253_v63 = vadd.f32 %v1693_v4, %v252_v57  ;;  %1224 = vmatprep.mubr.f32.mxu1 %v393_v51  ;;  %v396_v8 = vmax.f32 %v258_v55, 0.0  ;;  %v409_v17 = vmax.f32 %v323_v5, 0.0  ;;  %v338_v21 = vadd.f32 %v1704_v61, %v1693_v4 }
 0x11e   :  { %v1152_v1 = vpop.f32.mrf.mxu0  ;;  %1225 = vmatmul.mubr.f32.gmra.mxu1 %v394_v53  ;;  %v332_v12 = vpop.f32.mrf.mxu1 }
 0x11f   :  { %v395_v3 = vmax.f32 %v253_v63, 0.0  ;;  %v268_v10 = vadd.f32 %v1152_v1, %v1693_v4  ;;  %v333_v18 = vadd.f32 %v1693_v4, %v332_v12  ;;  %v412_v45 = vmax.f32 %v338_v21, 0.0 }
 0x120   :  { %v262_v11 = vpop.f32.mrf.mxu0  ;;  %v1176_v24 = vpop.f32.mrf.mxu1 }
 0x121   :  { %v263_v13 = vadd.f32 %v1693_v4, %v262_v11  ;;  %1227 = vmatprep.mubr.f32.mxu1 %v395_v3  ;;  %v398_v16 = vmax.f32 %v268_v10, 0.0  ;;  %v411_v27 = vmax.f32 %v333_v18, 0.0  ;;  %v348_v47 = vadd.f32 %v1176_v24, %v1693_v4 }
 0x122   :  { %v1155_v14 = vpop.f32.mrf.mxu0  ;;  %1228 = vmatmul.mubr.f32.gmra.mxu1 %v396_v8  ;;  %v342_v36 = vpop.f32.mrf.mxu1 }
 0x123   :  { %v397_v15 = vmax.f32 %v263_v13, 0.0  ;;  %v278_v20 = vadd.f32 %v1155_v14, %v1693_v4  ;;  %v343_v30 = vadd.f32 %v1693_v4, %v342_v36  ;;  %v414_v55 = vmax.f32 %v348_v47, 0.0 }
 0x124   :  { %v272_v22 = vpop.f32.mrf.mxu0  ;;  %v1179_v48 = vpop.f32.mrf.mxu1 }
 0x125   :  { %v273_v26 = vadd.f32 %v1693_v4, %v272_v22  ;;  %1230 = vmatprep.mubr.f32.mxu1 %v397_v15  ;;  %v400_v31 = vmax.f32 %v278_v20, 0.0  ;;  %v413_v37 = vmax.f32 %v343_v30, 0.0  ;;  %v358_v57 = vadd.f32 %v1179_v48, %v1693_v4  ;;  %v1743_v48 = vld [vmem:[%s1798_s4] ss:$0 sm:$0xff]  ;;  %s1502_s4 = smov [#allocation10]  }
 0x126   :  { %v1158_v28 = vpop.f32.mrf.mxu0  ;;  %1231 = vmatmul.mubr.f32.gmra.mxu1 %v398_v16  ;;  %v352_v60 = vpop.f32.mrf.mxu1  ;;  %s949_s18 = sshll.u32 %s1502_s4, 4  ;;  %s950_s18 = int_to_ptr.vmem [resolvable:$true] %s949_s18 }
 0x127   :  { %v399_v29 = vmax.f32 %v273_v26, 0.0  ;;  %v288_v32 = vadd.f32 %v1158_v28, %v1693_v4  ;;  %v353_v43 = vadd.f32 %v1693_v4, %v352_v60  ;;  %v416_v3 = vmax.f32 %v358_v57, 0.0  ;;  %s1468_s19 = scalar_lea.vmem %s950_s18, 4096  ;;  %p1473_p7 = scmp.lt.s32.totalorder %s950_s18, %s950_s18 }
 0x128   :  { %v282_v34 = vpop.f32.mrf.mxu0  ;;  %v1182_v9 = vpop.f32.mrf.mxu1  ;;  %p1469_p6 = scmp.ne.s32.totalorder %s950_s18, %s1468_s19  ;;  %p1474_p8 = scmp.lt.s32.totalorder %s1468_s19, %s1468_s19 }
 0x129   :  { %v283_v38 = vadd.f32 %v1693_v4, %v282_v34  ;;  %1233 = vmatprep.mubr.f32.mxu1 %v399_v29  ;;  %v402_v42 = vmax.f32 %v288_v32, 0.0  ;;  %v415_v51 = vmax.f32 %v353_v43, 0.0  ;;  %v368_v8 = vadd.f32 %v1182_v9, %v1693_v4 }
 0x12a   :  { %v1161_v39 = vpop.f32.mrf.mxu0  ;;  %1234 = vmatmul.mubr.f32.gmra.mxu1 %v400_v31  ;;  %v362_v25 = vpop.f32.mrf.mxu1  ;;  %p1475_p9 = por %p1474_p8, %p1473_p7 }
 0x12b   :  { %v401_v40 = vmax.f32 %v283_v38, 0.0  ;;  %v298_v44 = vadd.f32 %v1161_v39, %v1693_v4  ;;  %v363_v53 = vadd.f32 %v1693_v4, %v362_v25  ;;  %v418_v13 = vmax.f32 %v368_v8, 0.0 }
 0x12c   :  { %v292_v46 = vpop.f32.mrf.mxu0  ;;  %v1185_v35 = vpop.f32.mrf.mxu1  ;;  %p1476_p10 = pnand %p1475_p9, %p1469_p6 }
 0x12d   :  { %v293_v49 = vadd.f32 %v1693_v4, %v292_v46  ;;  %1236 = vmatprep.mubr.f32.mxu1 %v401_v40  ;;  %v404_v56 = vmax.f32 %v298_v44, 0.0  ;;  %v417_v61 = vmax.f32 %v363_v53, 0.0  ;;  %v378_v14 = vadd.f32 %v1185_v35, %v1693_v4 }
 0x12e   :  { %v1164_v50 = vpop.f32.mrf.mxu0  ;;  %1237 = vmatmul.mubr.f32.gmra.mxu1 %v402_v42  ;;  %v372_v41 = vpop.f32.mrf.mxu1 }
 0x12f   :  { %v403_v52 = vmax.f32 %v293_v49, 0.0  ;;  %v308_v58 = vadd.f32 %v1164_v50, %v1693_v4  ;;  %v373_v1 = vadd.f32 %v1693_v4, %v372_v41  ;;  %v420_v16 = vmax.f32 %v378_v14, 0.0 }
 0x130   :  { %v302_v59 = vpop.f32.mrf.mxu0  ;;  %v1188_v63 = vpop.f32.mrf.mxu1 }
 0x131   :  { %v303_v62 = vadd.f32 %v1693_v4, %v302_v59  ;;  %1239 = vmatprep.mubr.f32.mxu1 %v403_v52  ;;  %v406_v6 = vmax.f32 %v308_v58, 0.0  ;;  %v419_v11 = vmax.f32 %v373_v1, 0.0  ;;  %v388_v20 = vadd.f32 %v1188_v63, %v1693_v4 }
 0x132   :  { %1240 = vmatmul.mubr.f32.gmra.mxu1 %v404_v56  ;;  %v382_v10 = vpop.f32.mrf.mxu1 }
 0x133   :  { %v405_v0 = vmax.f32 %v303_v62, 0.0  ;;  %v383_v12 = vadd.f32 %v1693_v4, %v382_v10  ;;  %v422_v22 = vmax.f32 %v388_v20, 0.0 }
 0x135   :  { %1242 = vmatprep.mubr.f32.mxu1 %v405_v0  ;;  %v421_v15 = vmax.f32 %v383_v12, 0.0 }
 0x136   :  { %1243 = vmatmul.mubr.f32.gmra.mxu1 %v406_v6 }
 0x137   :  { %1245 = vmatprep.mubr.f32.mxu1 %v407_v2 }
 0x13a   :  { %1246 = vmatmul.mubr.f32.gmra.mxu1 %v408_v19 }
 0x13b   :  { %1248 = vmatprep.mubr.f32.mxu1 %v409_v17 }
 0x13e   :  { %1249 = vmatmul.mubr.f32.gmra.mxu1 %v410_v33 }
 0x13f   :  { %1251 = vmatprep.mubr.f32.mxu1 %v411_v27 }
 0x142   :  { %1252 = vmatmul.mubr.f32.gmra.mxu1 %v412_v45 }
 0x143   :  { %1254 = vmatprep.mubr.f32.mxu1 %v413_v37  ;;  %v1303_v24 = vpop.f32.mrf.mxu0 }
 0x145   :  { %v753_v26 = vpop.f32.mrf.mxu0 }
 0x146   :  { %1255 = vmatmul.mubr.f32.gmra.mxu1 %v414_v55 }
 0x147   :  { %1257 = vmatprep.mubr.f32.mxu1 %v415_v51  ;;  %v1306_v28 = vpop.f32.mrf.mxu0 }
 0x149   :  { %v763_v29 = vpop.f32.mrf.mxu0 }
 0x14a   :  { %1258 = vmatmul.mubr.f32.gmra.mxu1 %v416_v3 }
 0x14b   :  { %1260 = vmatprep.mubr.f32.mxu1 %v417_v61  ;;  %v1309_v31 = vpop.f32.mrf.mxu0 }
 0x14d   :  { %v773_v32 = vpop.f32.mrf.mxu0 }
 0x14e   :  { %1261 = vmatmul.mubr.f32.gmra.mxu1 %v418_v13 }
 0x14f   :  { %1263 = vmatprep.mubr.f32.mxu1 %v419_v11  ;;  %v1312_v34 = vpop.f32.mrf.mxu0 }
 0x151   :  { %v783_v36 = vpop.f32.mrf.mxu0 }
 0x152   :  { %1264 = vmatmul.mubr.f32.gmra.mxu1 %v420_v16 }
 0x153   :  { %1266 = vmatprep.mubr.f32.mxu1 %v421_v15  ;;  %v1315_v38 = vpop.f32.mrf.mxu0 }
 0x155   :  { %v793_v39 = vpop.f32.mrf.mxu0 }
 0x156   :  { %1267 = vmatmul.mubr.f32.gmra.mxu1 %v422_v22 }
 0x157   :  { %v1318_v40 = vpop.f32.mrf.mxu0 }
 0x159   :  { %v803_v42 = vpop.f32.mrf.mxu0 }
 0x15b   :  { %v1321_v44 = vpop.f32.mrf.mxu0 }
 0x15d   :  { %v1736_v46 = vpop.f32.mrf.mxu0 }
 0x15f   :  { %v1738_v4 = vpop.f32.mrf.mxu0 }
 0x161   :  { %v1745_v50 = vpop.f32.mrf.mxu0 }
 0x163   :  { %v1749_v60 = vpop.f32.mrf.mxu0 }
 0x165   :  { %v1753_v9 = vpop.f32.mrf.mxu0 }
 0x167   :  { %v1330_v30 = vpop.f32.mrf.mxu0 }
 0x169   :  { %v843_v47 = vpop.f32.mrf.mxu0 }
 0x16b   :  { %v1333_v61 = vpop.f32.mrf.mxu0 }
 0x16d   :  { %v853_v13 = vpop.f32.mrf.mxu0 }
 0x1da   :  { %v1223_v49 = vpop.f32.mrf.mxu1 }
 0x1db   :  { %v518_v52 = vadd.f32 %v1223_v49, %v1743_v48 }
 0x1dc   :  { %v512_v54 = vpop.f32.mrf.mxu1 }
 0x1dd   :  { %v759_v56 = vadd.f32 %v1303_v24, %v518_v52  ;;  %v513_v58 = vadd.f32 %v1743_v48, %v512_v54 }
 0x1de   :  { %v1226_v59 = vpop.f32.mrf.mxu1 }
 0x1df   :  { %913 = vst [vmem:[#allocation10 + $0x8] sm:$0xff] %v759_v56  ;;  %v754_v62 = vadd.f32 %v753_v26, %v513_v58  ;;  %v528_v0 = vadd.f32 %v1226_v59, %v1743_v48  ;;  %v1336_v26 = vpop.f32.mrf.mxu0 }
 0x1e0   :  { %v522_v2 = vpop.f32.mrf.mxu1 }
 0x1e1   :  { %912 = vst [vmem:[#allocation10] sm:$0xff] %v754_v62  ;;  %v769_v5 = vadd.f32 %v1306_v28, %v528_v0  ;;  %v523_v6 = vadd.f32 %v1743_v48, %v522_v2 }
 0x1e2   :  { %v1229_v7 = vpop.f32.mrf.mxu1 }
 0x1e3   :  { %915 = vst [vmem:[#allocation10 + $0x18] sm:$0xff] %v769_v5  ;;  %v764_v17 = vadd.f32 %v763_v29, %v523_v6  ;;  %v538_v18 = vadd.f32 %v1229_v7, %v1743_v48 }
 0x1e4   :  { %v532_v19 = vpop.f32.mrf.mxu1 }
 0x1e5   :  { %914 = vst [vmem:[#allocation10 + $0x10] sm:$0xff] %v764_v17  ;;  %v779_v23 = vadd.f32 %v1309_v31, %v538_v18  ;;  %v533_v25 = vadd.f32 %v1743_v48, %v532_v19 }
 0x1e6   :  { %v1232_v27 = vpop.f32.mrf.mxu1 }
 0x1e7   :  { %917 = vst [vmem:[#allocation10 + $0x28] sm:$0xff] %v779_v23  ;;  %v774_v33 = vadd.f32 %v773_v32, %v533_v25  ;;  %v548_v21 = vadd.f32 %v1232_v27, %v1743_v48 }
 0x1e8   :  { %v542_v35 = vpop.f32.mrf.mxu1 }
 0x1e9   :  { %916 = vst [vmem:[#allocation10 + $0x20] sm:$0xff] %v774_v33  ;;  %v789_v37 = vadd.f32 %v1312_v34, %v548_v21  ;;  %v543_v43 = vadd.f32 %v1743_v48, %v542_v35 }
 0x1ea   :  { %v1235_v45 = vpop.f32.mrf.mxu1 }
 0x1eb   :  { %919 = vst [vmem:[#allocation10 + $0x38] sm:$0xff] %v789_v37  ;;  %v784_v41 = vadd.f32 %v783_v36, %v543_v43  ;;  %v558_v51 = vadd.f32 %v1235_v45, %v1743_v48 }
 0x1ec   :  { %v552_v53 = vpop.f32.mrf.mxu1 }
 0x1ed   :  { %918 = vst [vmem:[#allocation10 + $0x30] sm:$0xff] %v784_v41  ;;  %v799_v55 = vadd.f32 %v1315_v38, %v558_v51  ;;  %v553_v57 = vadd.f32 %v1743_v48, %v552_v53  ;;  %v863_v38 = vpop.f32.mrf.mxu0 }
 0x1ee   :  { %v1238_v63 = vpop.f32.mrf.mxu1 }
 0x1ef   :  { %921 = vst [vmem:[#allocation10 + $0x48] sm:$0xff] %v799_v55  ;;  %v794_v1 = vadd.f32 %v793_v39, %v553_v57  ;;  %v568_v3 = vadd.f32 %v1238_v63, %v1743_v48  ;;  %v1339_v52 = vpop.f32.mrf.mxu0 }
 0x1f0   :  { %v562_v8 = vpop.f32.mrf.mxu1 }
 0x1f1   :  { %920 = vst [vmem:[#allocation10 + $0x40] sm:$0xff] %v794_v1  ;;  %v809_v10 = vadd.f32 %v1318_v40, %v568_v3  ;;  %v563_v11 = vadd.f32 %v1743_v48, %v562_v8  ;;  %v873_v62 = vpop.f32.mrf.mxu0 }
 0x1f2   :  { %v1241_v12 = vpop.f32.mrf.mxu1 }
 0x1f3   :  { %923 = vst [vmem:[#allocation10 + $0x58] sm:$0xff] %v809_v10  ;;  %v804_v14 = vadd.f32 %v803_v42, %v563_v11  ;;  %v578_v15 = vadd.f32 %v1241_v12, %v1743_v48 }
 0x1f4   :  { %v572_v16 = vpop.f32.mrf.mxu1 }
 0x1f5   :  { %922 = vst [vmem:[#allocation10 + $0x50] sm:$0xff] %v804_v14  ;;  %v819_v20 = vadd.f32 %v1321_v44, %v578_v15  ;;  %v573_v22 = vadd.f32 %v1743_v48, %v572_v16 }
 0x1f6   :  { %v1244_v24 = vpop.f32.mrf.mxu1 }
 0x1f7   :  { %925 = vst [vmem:[#allocation10 + $0x68] sm:$0xff] %v819_v20  ;;  %v814_v28 = vadd.f32 %v1736_v46, %v573_v22  ;;  %v588_v29 = vadd.f32 %v1244_v24, %v1743_v48 }
 0x1f8   :  { %v582_v31 = vpop.f32.mrf.mxu1 }
 0x1f9   :  { %924 = vst [vmem:[#allocation10 + $0x60] sm:$0xff] %v814_v28  ;;  %v829_v32 = vadd.f32 %v1738_v4, %v588_v29  ;;  %v583_v34 = vadd.f32 %v1743_v48, %v582_v31 }
 0x1fa   :  { %v1247_v36 = vpop.f32.mrf.mxu1 }
 0x1fb   :  { %927 = vst [vmem:[#allocation10 + $0x78] sm:$0xff] %v829_v32  ;;  %v824_v39 = vadd.f32 %v1745_v50, %v583_v34  ;;  %v598_v40 = vadd.f32 %v1247_v36, %v1743_v48 }
 0x1fc   :  { %v592_v42 = vpop.f32.mrf.mxu1 }
 0x1fd   :  { %926 = vst [vmem:[#allocation10 + $0x70] sm:$0xff] %v824_v39  ;;  %v839_v44 = vadd.f32 %v1749_v60, %v598_v40  ;;  %v593_v46 = vadd.f32 %v1743_v48, %v592_v42 }
 0x1fe   :  { %v1250_v49 = vpop.f32.mrf.mxu1 }
 0x1ff   :  { %929 = vst [vmem:[#allocation10 + $0x88] sm:$0xff] %v839_v44  ;;  %v834_v4 = vadd.f32 %v1753_v9, %v593_v46  ;;  %v608_v54 = vadd.f32 %v1250_v49, %v1743_v48  ;;  %v1342_v9 = vpop.f32.mrf.mxu0 }
 0x200   :  { %v602_v56 = vpop.f32.mrf.mxu1 }
 0x201   :  { %928 = vst [vmem:[#allocation10 + $0x80] sm:$0xff] %v834_v4  ;;  %v849_v58 = vadd.f32 %v1330_v30, %v608_v54  ;;  %v603_v50 = vadd.f32 %v1743_v48, %v602_v56  ;;  %v883_v30 = vpop.f32.mrf.mxu0 }
 0x202   :  { %v1253_v59 = vpop.f32.mrf.mxu1 }
 0x203   :  { %931 = vst [vmem:[#allocation10 + $0x98] sm:$0xff] %v849_v58  ;;  %v844_v0 = vadd.f32 %v843_v47, %v603_v50  ;;  %v618_v60 = vadd.f32 %v1253_v59, %v1743_v48  ;;  %v1345_v47 = vpop.f32.mrf.mxu0 }
 0x204   :  { %v612_v2 = vpop.f32.mrf.mxu1 }
 0x205   :  { %930 = vst [vmem:[#allocation10 + $0x90] sm:$0xff] %v844_v0  ;;  %v859_v5 = vadd.f32 %v1333_v61, %v618_v60  ;;  %v613_v6 = vadd.f32 %v1743_v48, %v612_v2  ;;  %v893_v61 = vpop.f32.mrf.mxu0 }
 0x206   :  { %v1256_v7 = vpop.f32.mrf.mxu1 }
 0x207   :  { %933 = vst [vmem:[#allocation10 + $0xa8] sm:$0xff] %v859_v5  ;;  %v854_v17 = vadd.f32 %v853_v13, %v613_v6  ;;  %v628_v18 = vadd.f32 %v1256_v7, %v1743_v48  ;;  %v1348_v13 = vpop.f32.mrf.mxu0 }
 0x208   :  { %v622_v19 = vpop.f32.mrf.mxu1 }
 0x209   :  { %932 = vst [vmem:[#allocation10 + $0xa0] sm:$0xff] %v854_v17  ;;  %v869_v23 = vadd.f32 %v1336_v26, %v628_v18  ;;  %v623_v25 = vadd.f32 %v1743_v48, %v622_v19  ;;  %v903_v24 = vpop.f32.mrf.mxu0 }
 0x20a   :  { %v1259_v27 = vpop.f32.mrf.mxu1 }
 0x20b   :  { %935 = vst [vmem:[#allocation10 + $0xb8] sm:$0xff] %v869_v23  ;;  %v864_v33 = vadd.f32 %v863_v38, %v623_v25  ;;  %v638_v21 = vadd.f32 %v1259_v27, %v1743_v48 }
 0x20c   :  { %v632_v35 = vpop.f32.mrf.mxu1 }
 0x20d   :  { %934 = vst [vmem:[#allocation10 + $0xb0] sm:$0xff] %v864_v33  ;;  %v879_v37 = vadd.f32 %v1339_v52, %v638_v21  ;;  %v633_v43 = vadd.f32 %v1743_v48, %v632_v35 }
 0x20e   :  { %v1262_v45 = vpop.f32.mrf.mxu1 }
 0x20f   :  { %937 = vst [vmem:[#allocation10 + $0xc8] sm:$0xff] %v879_v37  ;;  %v874_v41 = vadd.f32 %v873_v62, %v633_v43  ;;  %v648_v51 = vadd.f32 %v1262_v45, %v1743_v48 }
 0x210   :  { %v642_v53 = vpop.f32.mrf.mxu1 }
 0x211   :  { %936 = vst [vmem:[#allocation10 + $0xc0] sm:$0xff] %v874_v41  ;;  %v889_v55 = vadd.f32 %v1342_v9, %v648_v51  ;;  %v643_v57 = vadd.f32 %v1743_v48, %v642_v53 }
 0x212   :  { %v1265_v63 = vpop.f32.mrf.mxu1 }
 0x213   :  { %939 = vst [vmem:[#allocation10 + $0xd8] sm:$0xff] %v889_v55  ;;  %v884_v1 = vadd.f32 %v883_v30, %v643_v57  ;;  %v658_v3 = vadd.f32 %v1265_v63, %v1743_v48 }
 0x214   :  { %v652_v8 = vpop.f32.mrf.mxu1 }
 0x215   :  { %938 = vst [vmem:[#allocation10 + $0xd0] sm:$0xff] %v884_v1  ;;  %v899_v10 = vadd.f32 %v1345_v47, %v658_v3  ;;  %v653_v11 = vadd.f32 %v1743_v48, %v652_v8 }
 0x216   :  { %v1268_v12 = vpop.f32.mrf.mxu1 }
 0x217   :  { %941 = vst [vmem:[#allocation10 + $0xe8] sm:$0xff] %v899_v10  ;;  %v894_v14 = vadd.f32 %v893_v61, %v653_v11  ;;  %v668_v15 = vadd.f32 %v1268_v12, %v1743_v48 }
 0x218   :  { %v662_v16 = vpop.f32.mrf.mxu1 }
 0x219   :  { %940 = vst [vmem:[#allocation10 + $0xe0] sm:$0xff] %v894_v14  ;;  %v909_v20 = vadd.f32 %v1348_v13, %v668_v15  ;;  %v663_v22 = vadd.f32 %v1743_v48, %v662_v16 }
 0x21b   :  { %943 = vst [vmem:[#allocation10 + $0xf8] sm:$0xff] %v909_v20  ;;  %v904_v26 = vadd.f32 %v903_v24, %v663_v22 }
 0x21d   :  { %942 = vst [vmem:[#allocation10 + $0xf0] sm:$0xff] %v904_v26 }
 0x21e   :  { %1479 = shalt.err (!%p1476_p10)
}
 0x21f   :  { %955 = dma.vmem_to_hbm [thread:$0]  %s950_s18, 4096, %s1800_s6, [#allocation4], %s1498_s26, %s1498_s26, %s1499_s27  }
 0x220   :  { %1494 = dma.done.wait [#allocation4], 4096  }
 0x221   :  { %1495 = vsyncadd [#allocation4], 4294963200 }
 0x222   :  { %959 = vsyncpa [#allocation3], 1 }
 0x223   :  { %960 = vsyncpa [#allocation6], 1 }
 0x224   :  { %961 = vsyncpa [#allocation9], 1 }
 0x225   :  { %962 = vsyncpa [#allocation4], 1 }

</bundles_post_ra>
